<compile_context>
chip_gen: v5e
topology: v5e:2x2
jax: 0.10.0
libtpu: 0.0.40
codegen_flags: <defaults>
</compile_context>

<pallas_src>
import jax
import jax.numpy as jnp
from jax.experimental import pallas as pl
from jax.experimental.pallas import tpu as pltpu


def _round_up(x, m):
    return ((x + m - 1) // m) * m


def _logistic_kernel(x_ref, w_ref, b_ref, o_ref):
    # x_ref: (TB, n) VMEM, w_ref: (1, n) VMEM, b_ref: (1, 1) SMEM, o_ref: (TB, 1)
    # VPU multiply + lane reduce (no MXU for a single-column GEMV).
    z = jnp.sum(x_ref[...] * w_ref[...], axis=-1, keepdims=True)  # (TB, 1) f32
    z = z + b_ref[0, 0]                                           # scalar bias from SMEM
    o_ref[...] = jax.nn.sigmoid(z).astype(o_ref.dtype)            # EUP exp + VPU


def logistic_forward(x, w, b, *, tb=512):
    """x: (B, n) f32, w: (1, n) f32 (Linear weight), b: (1, 1) f32 -> (B, 1) f32."""
    B, n = x.shape
    assert w.shape == (1, n)
    assert b.shape == (1, 1)

    # Tile the batch; keep the tile a multiple of 8 (sublane) and no larger
    # than the (padded) batch itself.
    tb = min(tb, _round_up(B, 8))
    B_pad = _round_up(B, tb)
    if B_pad != B:
        x = jnp.pad(x, ((0, B_pad - B), (0, 0)))

    grid = (B_pad // tb,)

    out = pl.pallas_call(
        _logistic_kernel,
        out_shape=jax.ShapeDtypeStruct((B_pad, 1), x.dtype),
        grid=grid,
        in_specs=[
            pl.BlockSpec((tb, n), lambda i: (i, 0)),                     # x tile streams over batch
            pl.BlockSpec((1, n), lambda i: (0, 0)),                      # weight row, replicated
            pl.BlockSpec(memory_space=pltpu.MemorySpace.SMEM),           # bias scalar in SMEM
        ],
        out_specs=pl.BlockSpec((tb, 1), lambda i: (i, 0)),
        compiler_params=pltpu.CompilerParams(
            dimension_semantics=("parallel",),   # shard batch grid across TCs (v7x megacore)
        ),
    )(x, w, b)

    return out[:B]


if __name__ == "__main__":
    key = jax.random.PRNGKey(0)
    k_x, k_w, k_b = jax.random.split(key, 3)

    batch, n = 8, 32

    # Deterministic parameter init (matches torch.nn.Linear's U(-1/sqrt(n), 1/sqrt(n)) scheme).
    bound = 1.0 / jnp.sqrt(jnp.float32(n))
    w = jax.random.uniform(k_w, (1, n), jnp.float32, -bound, bound)   # Linear weight (out=1, in=n)
    b = jax.random.uniform(k_b, (1, 1), jnp.float32, -bound, bound)   # Linear bias

    x = jax.random.normal(k_x, (batch, n), jnp.float32)

    out = logistic_forward(x, w, b)
    out = jax.block_until_ready(out)

    # Reference check against plain JAX.
    ref = jax.nn.sigmoid(x @ w.T + b)
    assert out.shape == (batch, 1)
    assert jnp.allclose(out, ref, atol=1e-5, rtol=1e-5)

    print("KERNEL_OK")
</pallas_src>

<mosaic_0001>
module attributes {stable_mosaic.version = 11 : i64} {
  func.func @_logistic_kernel(%arg0: i32, %arg1: memref<8x32xf32, #tpu.memory_space<vmem>>, %arg2: memref<1x32xf32, #tpu.memory_space<vmem>>, %arg3: memref<1x1xf32, #tpu.memory_space<smem>>, %arg4: memref<8x1xf32, #tpu.memory_space<vmem>>) attributes {dimension_semantics = [#tpu.dimension_semantics<parallel>], iteration_bounds = array<i64: 1>, scalar_prefetch = 0 : i64, scratch_operands = 0 : i64, tpu.core_type = #tpu.core_type<tc>, window_params = [{transform_indices = @transform_0, window_bounds = array<i64: 8, 32>}, {pipeline_mode = #tpu.pipeline_mode<synchronous>, transform_indices = @transform_1, window_bounds = array<i64: 1, 32>}, {transform_indices = @transform_2, window_bounds = array<i64: 1, 1>}, {transform_indices = @transform_3, window_bounds = array<i64: 8, 1>}]} {
    %c0 = arith.constant 0 : index
    %c0_0 = arith.constant 0 : index
    %0 = vector.load %arg1[%c0, %c0_0] : memref<8x32xf32, #tpu.memory_space<vmem>>, vector<8x32xf32>
    %c0_1 = arith.constant 0 : index
    %c0_2 = arith.constant 0 : index
    %1 = vector.load %arg2[%c0_1, %c0_2] : memref<1x32xf32, #tpu.memory_space<vmem>>, vector<1x32xf32>
    %2 = vector.broadcast %1 : vector<1x32xf32> to vector<8x32xf32>
    %3 = arith.mulf %0, %2 : vector<8x32xf32>
    %cst = arith.constant dense<0.000000e+00> : vector<8xf32>
    %4 = vector.multi_reduction <add>, %3, %cst [1] : vector<8x32xf32> to vector<8xf32>
    %5 = vector.shape_cast %4 : vector<8xf32> to vector<8x1xf32>
    %c0_3 = arith.constant 0 : index
    %c0_4 = arith.constant 0 : index
    %6 = memref.load %arg3[%c0_3, %c0_4] : memref<1x1xf32, #tpu.memory_space<smem>>
    %7 = vector.broadcast %6 : f32 to vector<8x1xf32>
    %8 = arith.addf %5, %7 : vector<8x1xf32>
    %9 = arith.negf %8 : vector<8x1xf32>
    %10 = math.exp %9 : vector<8x1xf32>
    %cst_5 = arith.constant 1.000000e+00 : f32
    %11 = vector.broadcast %cst_5 : f32 to vector<8x1xf32>
    %12 = arith.addf %11, %10 : vector<8x1xf32>
    %13 = arith.divf %11, %12 : vector<8x1xf32>
    %c0_6 = arith.constant 0 : index
    %c0_7 = arith.constant 0 : index
    %14 = vector.load %arg4[%c0_6, %c0_7] : memref<8x1xf32, #tpu.memory_space<vmem>>, vector<8x1xf32>
    tpu.vector_store %arg4[%c0_6, %c0_7], %13 {strides = array<i32>} : memref<8x1xf32, #tpu.memory_space<vmem>>, vector<8x1xf32>,
    return
  }
  func.func @transform_0(%arg0: i32) -> (i32, i32) {
    %c0_i32 = arith.constant 0 : i32
    %c0_i32_0 = arith.constant 0 : i32
    return %arg0, %c0_i32 : i32, i32
  }
  func.func @transform_1(%arg0: i32) -> (i32, i32) {
    %c0_i32 = arith.constant 0 : i32
    %c0_i32_0 = arith.constant 0 : i32
    %c0_i32_1 = arith.constant 0 : i32
    return %c0_i32, %c0_i32_0 : i32, i32
  }
  func.func @transform_2(%arg0: i32) -> (i32, i32) {
    %c0_i32 = arith.constant 0 : i32
    %c0_i32_0 = arith.constant 0 : i32
    %c0_i32_1 = arith.constant 0 : i32
    return %c0_i32, %c0_i32_0 : i32, i32
  }
  func.func @transform_3(%arg0: i32) -> (i32, i32) {
    %c0_i32 = arith.constant 0 : i32
    %c0_i32_0 = arith.constant 0 : i32
    return %arg0, %c0_i32 : i32, i32
  }
}

</mosaic_0001>

<bundles_post_ra>
// kernel: tpu_custom_call.1
= control target key start
LH: loop header
LB: loop body
LE: loop exit
PB: predicated region body
PF: predicated region fallthrough
CT: control target
= control target key end

     0   :  { %9 = vsyncpa [#allocation4], 0  ;;  %s101_s15 = smov [#allocation3]   ;;  %s134_s0 = inlined_call_operand.hbm [shape: f32[8,32], index: 0, kind: input, shape index: {}]   ;;  %s135_s1 = inlined_call_operand.vmem [shape: f32[1,32], index: 1, kind: input, shape index: {}]   ;;  %s136_s2 = inlined_call_operand.<no memory space> [shape: f32[1,1], index: 2, kind: input, shape index: {}]   ;;  %s137_s3 = inlined_call_operand.vmem [shape: f32[8,1], index: 3, kind: output, shape index: {}]  }
   0x1   :  { %s15_s14 = sshll.u32 %s134_s0, 4  ;;  %s17_s16 = sshll.u32 %s101_s15, 4  ;;  %s16_s14 = int_to_ptr.hbm [resolvable:$true] %s15_s14  ;;  %s18_s16 = int_to_ptr.vmem [resolvable:$true] %s17_s16 }
   0x2   :  { %20 = dma.hbm_to_vmem [thread:$0]  %s16_s14, 128, %s18_s16, [#allocation4]  }
   0x3   :  { %99 = dma.done.wait [#allocation4], 128  }
   0x4   :  { %100 = vsyncadd [#allocation4], 4294967168  ;;  %v29_v0 = vld [vmem:[#allocation3] sm:$0xff]  ;;  %vm35_vm0 = vcmask 261120   ;;  %v40_v4 = vstv %s136_s2  ;;  %vm61_vm4 = vcmask 7168  }
   0x5   :  { %v70_v1 = vld [vmem:[%s135_s1] ss:$0 sm:$0xff] }
   0x6   :  { %v34_v2 = vmul.f32 %v70_v1, %v29_v0 }
   0x8   :  { %v36_v3 = vsel %vm35_vm0, %v34_v2, 0.0 }
   0x9   :  { %37 = vadd.xlane.f32.xlu0 %v36_v3 }
  0x7c   :  { %v38_v5 = vpop.xlane.xlu0 %37 }
  0x7d   :  { %v41_v6 = vadd.f32 %v40_v4, %v38_v5 }
  0x7f   :  { %v68_v7 = vmul.f32 -1.442695, %v41_v6 }
  0x81   :  { %71 = vpow2.f32 %v68_v7 }
  0x87   :  { %v72_v8 = vpop.eup %71 }
  0x88   :  { %v45_v9 = vadd.f32 1.0, %v72_v8 }
  0x8a   :  { %73 = vrcp.f32 %v45_v9  ;;  %v57_v13 = vand.u32 2147483648, %v45_v9  ;;  %v55_v15 = vand.u32 2147483647, %v45_v9  ;;  %vm51_vm2 = vweird.f32 %v45_v9 }
  0x8c   :  { %v58_v17 = vor.u32 1.1754944e-38, %v57_v13  ;;  %vm56_vm5 = vcmp.eq.f32.partialorder %v55_v15, 8.507059e+37 }
  0x90   :  { %v74_v10 = vpop.eup %73 }
  0x91   :  { %v47_v11 = vmul.f32 %v74_v10, %v45_v9  ;;  %vm52_vm1 = vweird.f32 %v74_v10 }
  0x92   :  { %vm53_vm3 = vmor %vm51_vm2, %vm52_vm1 }
  0x93   :  { %v48_v12 = vsub.f32 1.0, %v47_v11 }
  0x95   :  { %v49_v14 = vmul.f32 %v74_v10, %v48_v12 }
  0x97   :  { %v50_v16 = vadd.f32 %v74_v10, %v49_v14 }
  0x99   :  { %v54_v18 = vsel %vm53_vm3, %v74_v10, %v50_v16 }
  0x9a   :  { %v59_v19 = vsel %vm56_vm5, %v58_v17, %v54_v18 }
  0x9b   :  { %62 = vst.msk [vmem:[%s137_s3] sm:$0xff] %vm61_vm4, %v59_v19 }
  0x9c   :  { %67 = vsyncpa [#allocation4], 1 }

</bundles_post_ra>
